<compile_context>
chip_gen: v7x
topology: tpu7x:2x2x1
jax: 0.10.0
libtpu: 0.0.40
codegen_flags: <defaults>
</compile_context>

<pallas_src>
import functools

import jax
import jax.numpy as jnp
from jax.experimental import pallas as pl
from jax.experimental.pallas import tpu as pltpu

_OUT_LANES = 128  # width of each per-row-block partial-sum output slab


def _ls_ce_kernel(x_ref, tgt_ref, out_ref, m_sc, se_sc, sx_sc, xt_sc, *,
                  smoothing, n_rows, n_classes, tile_n, tile_c, out_lanes):
    i = pl.program_id(0)          # row-block index
    j = pl.program_id(1)          # class-block index (innermost / reduction axis)
    n_cblk = pl.num_programs(1)

    x = x_ref[...]                # (tile_n, tile_c), kept in the input dtype
    tgt = tgt_ref[...]            # (tile_n, 1) int32

    # Lane iota only (1, tile_c); broadcasting against (tile_n, 1) handles sublanes.
    col = j * tile_c + jax.lax.broadcasted_iota(jnp.int32, (1, tile_c), 1)

    # Class-axis ragged handling is a compile-time decision: only pay the selects when
    # C is not a multiple of tile_c.
    c_ragged = (n_classes % tile_c) != 0
    if c_ragged:
        cvalid = col < n_classes                                   # (1, tile_c)
        x_for_max = jnp.where(cvalid, x, jnp.array(-jnp.inf, x.dtype))
        x_for_sum = jnp.where(cvalid, x, jnp.zeros((), x.dtype))
    else:
        x_for_max = x
        x_for_sum = x

    @pl.when(j == 0)
    def _():
        m_sc[...] = jnp.full_like(m_sc, -jnp.inf)
        se_sc[...] = jnp.zeros_like(se_sc)
        sx_sc[...] = jnp.zeros_like(sx_sc)
        xt_sc[...] = jnp.zeros_like(xt_sc)

    # ---- online logsumexp update (f32 accumulation) ----
    m_old = m_sc[...]                                              # (tile_n, 1) f32
    m_blk = jnp.max(x_for_max, axis=-1, keepdims=True).astype(jnp.float32)
    m_new = jnp.maximum(m_old, m_blk)

    # exp argument in f32 (EUP); masked ragged lanes are exp(-inf) = 0 automatically.
    ex = jnp.exp(x_for_max.astype(jnp.float32) - m_new)
    alpha = jnp.exp(m_old - m_new)
    se_sc[...] = alpha * se_sc[...] + jnp.sum(ex, axis=-1, keepdims=True)

    # ---- running sum(x) and x[row, tgt] (f32 accumulation) ----
    sx_sc[...] = sx_sc[...] + jnp.sum(x_for_sum, axis=-1, keepdims=True,
                                      dtype=jnp.float32)
    hit = col == tgt                                               # (tile_n, tile_c)
    xt_sc[...] = xt_sc[...] + jnp.sum(jnp.where(hit, x, jnp.zeros((), x.dtype)),
                                      axis=-1, keepdims=True, dtype=jnp.float32)
    m_sc[...] = m_new

    @pl.when(j == n_cblk - 1)
    def _():
        lse = jnp.log(se_sc[...]) + m_sc[...]                      # (tile_n, 1)
        confidence = 1.0 - smoothing
        row_loss = lse - confidence * xt_sc[...] - (smoothing / n_classes) * sx_sc[...]
        # Discard ragged padding rows (garbage / NaN stays confined to its own row and
        # is dropped here by the select).
        row = i * tile_n + jax.lax.broadcasted_iota(jnp.int32, (tile_n, 1), 0)
        row_loss = jnp.where(row < n_rows, row_loss, 0.0)
        partial = jnp.sum(row_loss, axis=0, keepdims=True)         # (1, 1)
        out_ref[...] = jnp.broadcast_to(partial, (1, out_lanes)).astype(jnp.float32)


def _vmem_capacity_bytes():
    try:
        cap = getattr(pltpu.get_tpu_info(), "vmem_capacity_bytes", None)
        if cap:
            return int(cap)
    except Exception:
        pass
    return 64 << 20  # conservative fallback (v7x per-TC)


def _choose_tiles(n, c, itemsize, budget):
    """Pick (tile_n, tile_c) from a VMEM working-set byte budget."""
    align_n = max(8, 32 // itemsize)          # sublane alignment: 8 f32, 16 bf16
    per_elem = 2 * itemsize + 8               # double-buffered input + ~2 f32 temps
    n_floor = max(align_n, (n // align_n) * align_n)

    rows_full_c = budget // max(c * per_elem, 1)
    if rows_full_c >= min(256, n_floor):
        # Full class axis fits with healthy row tiles: single class block.
        tile_c = c
        tile_n = min(max(align_n, (rows_full_c // align_n) * align_n), 8192, n_floor)
    else:
        # ArcFace-scale C: tile the class axis (flash-style online LSE in-kernel).
        tile_n = min(512, n_floor)
        tile_c = max(128, (budget // (tile_n * per_elem) // 128) * 128)
        if tile_c >= c:
            tile_c = c

    # Megacore: prefer >=4 row blocks (v7x has 2 TCs) as long as tiles stay >=256 rows.
    quarter = (n // 4 // align_n) * align_n
    if quarter >= 256:
        tile_n = min(tile_n, quarter)
    return int(tile_n), int(tile_c)


def label_smoothing_cross_entropy(x, target, smoothing=0.1, *, tile_n=None, tile_c=None):
    """x: (N, C) logits (f32 or bf16); target: (N,) int class indices. Scalar f32 loss."""
    n, c = x.shape
    itemsize = jnp.dtype(x.dtype).itemsize

    phys = _vmem_capacity_bytes()
    budget = min(max(phys // 3, 16 << 20), 48 << 20)   # per-step working-set budget
    auto_n, auto_c = _choose_tiles(n, c, itemsize, budget)
    if tile_n is None:
        tile_n = auto_n
    if tile_c is None:
        tile_c = auto_c

    num_row_blocks = pl.cdiv(n, tile_n)
    num_c_blocks = pl.cdiv(c, tile_c)

    tgt2d = target.astype(jnp.int32).reshape(n, 1)

    kernel = functools.partial(
        _ls_ce_kernel,
        smoothing=float(smoothing),
        n_rows=n,
        n_classes=c,
        tile_n=tile_n,
        tile_c=tile_c,
        out_lanes=_OUT_LANES,
    )

    # Generation-aware scoped-VMEM limit: enough for the double-buffered tile + temps,
    # with headroom, capped at 3/4 of physical per-TC VMEM.
    needed = tile_n * tile_c * (2 * itemsize + 8) + (1 << 20)
    vmem_limit = int(min(max(needed + (16 << 20), 32 << 20), (phys * 3) // 4))

    cost = pl.CostEstimate(
        flops=int(5 * n * c),
        transcendentals=int(n * c),
        bytes_accessed=int(n * c * itemsize + n * 4 + num_row_blocks * _OUT_LANES * 4),
    )

    partials = pl.pallas_call(
        kernel,
        out_shape=jax.ShapeDtypeStruct((1, num_row_blocks * _OUT_LANES), jnp.float32),
        grid_spec=pltpu.PrefetchScalarGridSpec(
            num_scalar_prefetch=0,
            grid=(num_row_blocks, num_c_blocks),
            in_specs=[
                pl.BlockSpec((tile_n, tile_c), lambda i, j: (i, j)),
                pl.BlockSpec((tile_n, 1), lambda i, j: (i, 0)),
            ],
            out_specs=pl.BlockSpec((1, _OUT_LANES), lambda i, j: (0, i)),
            scratch_shapes=[pltpu.VMEM((tile_n, 1), jnp.float32)] * 4,
        ),
        compiler_params=pltpu.CompilerParams(
            dimension_semantics=("parallel", "arbitrary"),
            vmem_limit_bytes=vmem_limit,
        ),
        cost_estimate=cost,
    )(x, tgt2d)

    # Lane 0 of each per-row-block slab holds that block's loss-sum.
    per_block = partials.reshape(num_row_blocks, _OUT_LANES)[:, 0]
    return jnp.sum(per_block) / n


def _reference(x, target, smoothing=0.1):
    confidence = 1.0 - smoothing
    logprobs = jax.nn.log_softmax(x.astype(jnp.float32), axis=-1)
    nll = -jnp.take_along_axis(logprobs, target[:, None], axis=-1)[:, 0]
    smooth = -jnp.mean(logprobs, axis=-1)
    return jnp.mean(confidence * nll + smoothing * smooth)


if __name__ == "__main__":
    key = jax.random.PRNGKey(0)
    kx, kt, kx2, kt2 = jax.random.split(key, 4)

    # Small deterministic shapes; N deliberately not a multiple of 8.
    N, C = 50, 256
    x = jax.random.normal(kx, (N, C), dtype=jnp.float32) * 3.0
    target = jax.random.randint(kt, (N,), 0, C, dtype=jnp.int32)
    ref = _reference(x, target, smoothing=0.1)

    # 1) Auto tiles (ragged last row block handled in-kernel).
    loss = label_smoothing_cross_entropy(x, target, smoothing=0.1)
    jax.block_until_ready(loss)
    assert jnp.allclose(loss, ref, atol=1e-5, rtol=1e-5), (loss, ref)

    # 2) Forced small row tile: multi row-block grid + ragged last row block.
    loss2 = label_smoothing_cross_entropy(x, target, smoothing=0.1, tile_n=16)
    jax.block_until_ready(loss2)
    assert jnp.allclose(loss2, ref, atol=1e-5, rtol=1e-5), (loss2, ref)

    # 3) Forced class tiling (2 class blocks): exercises the online-LSE path.
    loss3 = label_smoothing_cross_entropy(x, target, smoothing=0.1, tile_n=16, tile_c=128)
    jax.block_until_ready(loss3)
    assert jnp.allclose(loss3, ref, atol=1e-5, rtol=1e-5), (loss3, ref)

    # 4) Ragged class axis (C not a multiple of the class tile) + ragged rows.
    N2, C2 = 24, 200
    x2 = jax.random.normal(kx2, (N2, C2), dtype=jnp.float32) * 2.0
    t2 = jax.random.randint(kt2, (N2,), 0, C2, dtype=jnp.int32)
    ref2 = _reference(x2, t2, smoothing=0.1)
    loss4 = label_smoothing_cross_entropy(x2, t2, smoothing=0.1, tile_n=16, tile_c=128)
    jax.block_until_ready(loss4)
    assert jnp.allclose(loss4, ref2, atol=1e-5, rtol=1e-5), (loss4, ref2)

    # 5) bf16 logits (lazy upcast path; accumulation stays f32 in-kernel).
    xb = x.astype(jnp.bfloat16)
    refb = _reference(xb.astype(jnp.float32), target, smoothing=0.1)
    lossb = label_smoothing_cross_entropy(xb, target, smoothing=0.1)
    jax.block_until_ready(lossb)
    assert jnp.allclose(lossb, refb, atol=1e-3, rtol=1e-3), (lossb, refb)

    print("KERNEL_OK")
</pallas_src>

<mosaic_0001>
module attributes {stable_mosaic.version = 11 : i64} {
  func.func @_ls_ce_kernel(%arg0: i32, %arg1: i32, %arg2: memref<48x256xf32, #tpu.memory_space<vmem>>, %arg3: memref<48x1xi32, #tpu.memory_space<vmem>>, %arg4: memref<1x128xf32, #tpu.memory_space<vmem>>, %arg5: memref<48x1xf32, #tpu.memory_space<vmem>>, %arg6: memref<48x1xf32, #tpu.memory_space<vmem>>, %arg7: memref<48x1xf32, #tpu.memory_space<vmem>>, %arg8: memref<48x1xf32, #tpu.memory_space<vmem>>) attributes {dimension_semantics = [#tpu.dimension_semantics<parallel>, #tpu.dimension_semantics<arbitrary>], iteration_bounds = array<i64: 2, 1>, scalar_prefetch = 0 : i64, scratch_operands = 4 : i64, tpu.core_type = #tpu.core_type<tc>, window_params = [{transform_indices = @transform_0, window_bounds = array<i64: 48, 256>}, {transform_indices = @transform_1, window_bounds = array<i64: 48, 1>}, {transform_indices = @transform_2, window_bounds = array<i64: 1, 128>}]} {
    %c0 = arith.constant 0 : index
    %c0_0 = arith.constant 0 : index
    %0 = vector.load %arg2[%c0, %c0_0] : memref<48x256xf32, #tpu.memory_space<vmem>>, vector<48x256xf32>
    %c0_1 = arith.constant 0 : index
    %c0_2 = arith.constant 0 : index
    %1 = vector.load %arg3[%c0_1, %c0_2] : memref<48x1xi32, #tpu.memory_space<vmem>>, vector<48x1xi32>
    %c256_i32 = arith.constant 256 : i32
    %2 = arith.muli %arg1, %c256_i32 : i32
    %3 = tpu.iota {dimensions = array<i32: 1>} : vector<1x256xi32>
    %4 = vector.broadcast %2 : i32 to vector<1x256xi32>
    %5 = arith.addi %4, %3 : vector<1x256xi32>
    %c0_i32 = arith.constant 0 : i32
    %6 = arith.cmpi eq, %arg1, %c0_i32 : i32
    %7 = arith.extui %6 : i1 to i32
    %c0_i32_3 = arith.constant 0 : i32
    %8 = arith.cmpi ne, %7, %c0_i32_3 : i32
    scf.if %8 {
      %cst_26 = arith.constant 0xFF800000 : f32
      %43 = vector.broadcast %cst_26 : f32 to vector<48x1xf32>
      %c0_27 = arith.constant 0 : index
      %c0_28 = arith.constant 0 : index
      %44 = vector.load %arg5[%c0_27, %c0_28] : memref<48x1xf32, #tpu.memory_space<vmem>>, vector<48x1xf32>
      tpu.vector_store %arg5[%c0_27, %c0_28], %43 {strides = array<i32>} : memref<48x1xf32, #tpu.memory_space<vmem>>, vector<48x1xf32>,
      %cst_29 = arith.constant 0.000000e+00 : f32
      %45 = vector.broadcast %cst_29 : f32 to vector<48x1xf32>
      %c0_30 = arith.constant 0 : index
      %c0_31 = arith.constant 0 : index
      %46 = vector.load %arg6[%c0_30, %c0_31] : memref<48x1xf32, #tpu.memory_space<vmem>>, vector<48x1xf32>
      tpu.vector_store %arg6[%c0_30, %c0_31], %45 {strides = array<i32>} : memref<48x1xf32, #tpu.memory_space<vmem>>, vector<48x1xf32>,
      %cst_32 = arith.constant 0.000000e+00 : f32
      %47 = vector.broadcast %cst_32 : f32 to vector<48x1xf32>
      %c0_33 = arith.constant 0 : index
      %c0_34 = arith.constant 0 : index
      %48 = vector.load %arg7[%c0_33, %c0_34] : memref<48x1xf32, #tpu.memory_space<vmem>>, vector<48x1xf32>
      tpu.vector_store %arg7[%c0_33, %c0_34], %47 {strides = array<i32>} : memref<48x1xf32, #tpu.memory_space<vmem>>, vector<48x1xf32>,
      %cst_35 = arith.constant 0.000000e+00 : f32
      %49 = vector.broadcast %cst_35 : f32 to vector<48x1xf32>
      %c0_36 = arith.constant 0 : index
      %c0_37 = arith.constant 0 : index
      %50 = vector.load %arg8[%c0_36, %c0_37] : memref<48x1xf32, #tpu.memory_space<vmem>>, vector<48x1xf32>
      tpu.vector_store %arg8[%c0_36, %c0_37], %49 {strides = array<i32>} : memref<48x1xf32, #tpu.memory_space<vmem>>, vector<48x1xf32>,
    } else {
    }
    %c0_4 = arith.constant 0 : index
    %c0_5 = arith.constant 0 : index
    %9 = vector.load %arg5[%c0_4, %c0_5] : memref<48x1xf32, #tpu.memory_space<vmem>>, vector<48x1xf32>
    %cst = arith.constant dense<0xFF800000> : vector<48xf32>
    %10 = vector.multi_reduction <maximumf>, %0, %cst [1] : vector<48x256xf32> to vector<48xf32>
    %11 = vector.shape_cast %10 : vector<48xf32> to vector<48x1xf32>
    %12 = arith.maximumf %9, %11 : vector<48x1xf32>
    %13 = vector.broadcast %12 : vector<48x1xf32> to vector<48x256xf32>
    %14 = arith.subf %0, %13 : vector<48x256xf32>
    %15 = math.exp %14 : vector<48x256xf32>
    %16 = arith.subf %9, %12 : vector<48x1xf32>
    %17 = math.exp %16 : vector<48x1xf32>
    %c0_6 = arith.constant 0 : index
    %c0_7 = arith.constant 0 : index
    %18 = vector.load %arg6[%c0_6, %c0_7] : memref<48x1xf32, #tpu.memory_space<vmem>>, vector<48x1xf32>
    %19 = arith.mulf %17, %18 : vector<48x1xf32>
    %cst_8 = arith.constant dense<0.000000e+00> : vector<48xf32>
    %20 = vector.multi_reduction <add>, %15, %cst_8 [1] : vector<48x256xf32> to vector<48xf32>
    %21 = vector.shape_cast %20 : vector<48xf32> to vector<48x1xf32>
    %22 = arith.addf %19, %21 : vector<48x1xf32>
    %c0_9 = arith.constant 0 : index
    %c0_10 = arith.constant 0 : index
    %23 = vector.load %arg6[%c0_9, %c0_10] : memref<48x1xf32, #tpu.memory_space<vmem>>, vector<48x1xf32>
    tpu.vector_store %arg6[%c0_9, %c0_10], %22 {strides = array<i32>} : memref<48x1xf32, #tpu.memory_space<vmem>>, vector<48x1xf32>,
    %c0_11 = arith.constant 0 : index
    %c0_12 = arith.constant 0 : index
    %24 = vector.load %arg7[%c0_11, %c0_12] : memref<48x1xf32, #tpu.memory_space<vmem>>, vector<48x1xf32>
    %cst_13 = arith.constant dense<0.000000e+00> : vector<48xf32>
    %25 = vector.multi_reduction <add>, %0, %cst_13 [1] : vector<48x256xf32> to vector<48xf32>
    %26 = vector.shape_cast %25 : vector<48xf32> to vector<48x1xf32>
    %27 = arith.addf %24, %26 : vector<48x1xf32>
    %c0_14 = arith.constant 0 : index
    %c0_15 = arith.constant 0 : index
    %28 = vector.load %arg7[%c0_14, %c0_15] : memref<48x1xf32, #tpu.memory_space<vmem>>, vector<48x1xf32>
    tpu.vector_store %arg7[%c0_14, %c0_15], %27 {strides = array<i32>} : memref<48x1xf32, #tpu.memory_space<vmem>>, vector<48x1xf32>,
    %29 = vector.broadcast %5 : vector<1x256xi32> to vector<48x256xi32>
    %30 = vector.broadcast %1 : vector<48x1xi32> to vector<48x256xi32>
    %31 = arith.cmpi eq, %29, %30 : vector<48x256xi32>
    %c0_16 = arith.constant 0 : index
    %c0_17 = arith.constant 0 : index
    %32 = vector.load %arg8[%c0_16, %c0_17] : memref<48x1xf32, #tpu.memory_space<vmem>>, vector<48x1xf32>
    %cst_18 = arith.constant 0.000000e+00 : f32
    %33 = vector.broadcast %cst_18 : f32 to vector<48x256xf32>
    %34 = arith.select %31, %0, %33 : vector<48x256xi1>, vector<48x256xf32>
    %cst_19 = arith.constant dense<0.000000e+00> : vector<48xf32>
    %35 = vector.multi_reduction <add>, %34, %cst_19 [1] : vector<48x256xf32> to vector<48xf32>
    %36 = vector.shape_cast %35 : vector<48xf32> to vector<48x1xf32>
    %37 = arith.addf %32, %36 : vector<48x1xf32>
    %c0_20 = arith.constant 0 : index
    %c0_21 = arith.constant 0 : index
    %38 = vector.load %arg8[%c0_20, %c0_21] : memref<48x1xf32, #tpu.memory_space<vmem>>, vector<48x1xf32>
    tpu.vector_store %arg8[%c0_20, %c0_21], %37 {strides = array<i32>} : memref<48x1xf32, #tpu.memory_space<vmem>>, vector<48x1xf32>,
    %c0_22 = arith.constant 0 : index
    %c0_23 = arith.constant 0 : index
    %39 = vector.load %arg5[%c0_22, %c0_23] : memref<48x1xf32, #tpu.memory_space<vmem>>, vector<48x1xf32>
    tpu.vector_store %arg5[%c0_22, %c0_23], %12 {strides = array<i32>} : memref<48x1xf32, #tpu.memory_space<vmem>>, vector<48x1xf32>,
    %c0_i32_24 = arith.constant 0 : i32
    %40 = arith.cmpi eq, %arg1, %c0_i32_24 : i32
    %41 = arith.extui %40 : i1 to i32
    %c0_i32_25 = arith.constant 0 : i32
    %42 = arith.cmpi ne, %41, %c0_i32_25 : i32
    scf.if %42 {
      %c0_26 = arith.constant 0 : index
      %c0_27 = arith.constant 0 : index
      %43 = vector.load %arg6[%c0_26, %c0_27] : memref<48x1xf32, #tpu.memory_space<vmem>>, vector<48x1xf32>
      %44 = math.log %43 : vector<48x1xf32>
      %c0_28 = arith.constant 0 : index
      %c0_29 = arith.constant 0 : index
      %45 = vector.load %arg5[%c0_28, %c0_29] : memref<48x1xf32, #tpu.memory_space<vmem>>, vector<48x1xf32>
      %46 = arith.addf %44, %45 : vector<48x1xf32>
      %c0_30 = arith.constant 0 : index
      %c0_31 = arith.constant 0 : index
      %47 = vector.load %arg8[%c0_30, %c0_31] : memref<48x1xf32, #tpu.memory_space<vmem>>, vector<48x1xf32>
      %cst_32 = arith.constant 0.899999976 : f32
      %48 = vector.broadcast %cst_32 : f32 to vector<48x1xf32>
      %49 = arith.mulf %48, %47 : vector<48x1xf32>
      %50 = arith.subf %46, %49 : vector<48x1xf32>
      %c0_33 = arith.constant 0 : index
      %c0_34 = arith.constant 0 : index
      %51 = vector.load %arg7[%c0_33, %c0_34] : memref<48x1xf32, #tpu.memory_space<vmem>>, vector<48x1xf32>
      %cst_35 = arith.constant 3.906250e-04 : f32
      %52 = vector.broadcast %cst_35 : f32 to vector<48x1xf32>
      %53 = arith.mulf %52, %51 : vector<48x1xf32>
      %54 = arith.subf %50, %53 : vector<48x1xf32>
      %c48_i32 = arith.constant 48 : i32
      %55 = arith.muli %arg0, %c48_i32 : i32
      %56 = tpu.iota {dimensions = array<i32: 0>} : vector<48x1xi32>
      %57 = vector.broadcast %55 : i32 to vector<48x1xi32>
      %58 = arith.addi %57, %56 : vector<48x1xi32>
      %c50_i32 = arith.constant 50 : i32
      %59 = vector.broadcast %c50_i32 : i32 to vector<48x1xi32>
      %60 = arith.cmpi slt, %58, %59 : vector<48x1xi32>
      %cst_36 = arith.constant 0.000000e+00 : f32
      %61 = vector.broadcast %cst_36 : f32 to vector<48x1xf32>
      %62 = arith.select %60, %54, %61 : vector<48x1xi1>, vector<48x1xf32>
      %cst_37 = arith.constant dense<0.000000e+00> : vector<1xf32>
      %63 = vector.multi_reduction <add>, %62, %cst_37 [0] : vector<48x1xf32> to vector<1xf32>
      %64 = vector.shape_cast %63 : vector<1xf32> to vector<1x1xf32>
      %65 = vector.shape_cast %64 : vector<1x1xf32> to vector<1x1xf32>
      %66 = vector.broadcast %65 : vector<1x1xf32> to vector<1x128xf32>
      %c0_38 = arith.constant 0 : index
      %c0_39 = arith.constant 0 : index
      %67 = vector.load %arg4[%c0_38, %c0_39] : memref<1x128xf32, #tpu.memory_space<vmem>>, vector<1x128xf32>
      tpu.vector_store %arg4[%c0_38, %c0_39], %66 {strides = array<i32>} : memref<1x128xf32, #tpu.memory_space<vmem>>, vector<1x128xf32>,
    } else {
    }
    return
  }
  func.func @transform_0(%arg0: i32, %arg1: i32) -> (i32, i32) {
    %c0_i32 = arith.constant 0 : i32
    return %arg0, %arg1 : i32, i32
  }
  func.func @transform_1(%arg0: i32, %arg1: i32) -> (i32, i32) {
    %c0_i32 = arith.constant 0 : i32
    %c0_i32_0 = arith.constant 0 : i32
    return %arg0, %c0_i32 : i32, i32
  }
  func.func @transform_2(%arg0: i32, %arg1: i32) -> (i32, i32) {
    %c0_i32 = arith.constant 0 : i32
    %c0_i32_0 = arith.constant 0 : i32
    return %c0_i32, %arg0 : i32, i32
  }
}

</mosaic_0001>

<bundles_post_ra>
// kernel: tpu_custom_call.1
= control target key start
LH: loop header
LB: loop body
LE: loop exit
PB: predicated region body
PF: predicated region fallthrough
CT: control target
= control target key end

     0   :  { %7 = vsyncpa [#allocation7], 0  ;;  %s1488_s0 = inlined_call_operand.hbm [shape: f32[50,256], index: 0, kind: input, shape index: {}]   ;;  %s1489_s1 = inlined_call_operand.vmem [shape: s32[50,1], index: 1, kind: input, shape index: {}]   ;;  %s1490_s2 = inlined_call_operand.hbm [shape: f32[1,256], index: 2, kind: output, shape index: {}]  }
   0x1   :  { %9 = vsyncpa [#allocation7 + $0x1], 0 }
   0x2   :  { %10 = vsyncpa [#allocation8], 0 }
   0x3   :  { %12 = vsyncpa [#allocation8 + $0x1], 0  ;;  %s1053_s9 = smov 0   ;;  %s1055_s10 = smov 0  }
   0x4   :  { %s1057_s11 = smov 0   ;;  %s1059_s12 = smov 0  }
   0x5   :  { %s1061_s13 = smov 0   ;;  %s1063_s14 = smov 0  }
   0x6 LB: > { %s786_s15 = sadd.s32 4294967295, %s1029_s14   ;;  %s787_s16 = sadd.s32 4294967294, %s1029_s14   ;;  %s1029_s14 = sphi %s1063_s14, %s18_s14   ;;  %s1025_s13 = sphi %s1061_s13, %s1501_s13   ;;  %s1021_s12 = sphi %s1059_s12, %s1500_s12   ;;  %s1017_s11 = sphi %s1057_s11, %s1499_s11   ;;  %s1013_s10 = sphi %s1055_s10, %s1498_s10   ;;  %s1009_s9 = sphi %s1053_s9, %s1497_s9  }
   0x7   : > { %s30_s17 = sadd.s32 1, %s1025_s13  ;;  %s39_s18 = sadd.s32 1, %s1017_s11 }
   0x8   : > { %p32_p0 = scmp.ge.s32.totalorder %s30_s17, 2  ;;  %p46_p1 = scmp.ne.s32.totalorder %s1017_s11, %s1013_s10 }
   0x9   : > { %p47_p2 = scmp.eq.s32.totalorder %s1029_s14, 0  ;;  %p52_p3 = scmp.ne.s32.totalorder %s1013_s10, %s1009_s9 }
   0xa   : > { %s1503_s17 = smov (%p32_p0, %s30_s17), 0  ;;  %p53_p5 = scmp.eq.s32.totalorder %s786_s15, 0 }
   0xb   : > { %p48_p4 = por %p47_p2, %p46_p1  ;;  %s34_s19 = ssub.s32 %s1025_s13, %s1503_s17 }
   0xc   : > { %p102_p6 = scmp.eq.s32.totalorder %s786_s15, 1  ;;  %p37_p7 = scmp.eq.s32.totalorder %s34_s19, 0 }
   0xd   : > { %p1096_p8 = por %p53_p5, %p52_p3  ;;  %p108_p10 = scmp.eq.s32.totalorder %s787_s16, 1 }
   0xe   : > { %p1100_p9 = por %p102_p6, %p46_p1  ;;  %p1491_p12 = scmp.ge.s32.totalorder %s1029_s14, 2 }
   0xf   : > { %s1105_s22 = scalar_select %p37_p7, %s1017_s11, %s39_s18  }
  0x10   : > { %p1107_p11 = por %p108_p10, %p52_p3  ;;  %124 = sbr.rel (%p1491_p12) target bundleno = 58 (0x3a), region = 16 }
  0x12   : > { %s1494_s23 = scalar_select %p1107_p11, 1, 0 }
  0x17   : > { %127 = sbr.rel (!%p48_p4) target bundleno = 58 (0x3a), region = 20  ;;  %s128_s24 = sand.u32 (%p48_p4), 1, %s1017_s11  }
  0x18   : > { %s133_s25 = smul.u32 (%p48_p4), 6, %s1025_s13  ;;  %s1119_s30 = scalar_lea.sflag (%p48_p4), [#allocation7], %s128_s24 }
  0x19   : > { %s806_s26 = smul.u32 (%p48_p4), 96, %s128_s24 }
  0x1a   : > { %s135_s27 = ssub.s32 (%p48_p4), 7, %s133_s25 }
  0x1b   : > { %p136_p13 = scmp.lt.s32.totalorder (%p48_p4), %s135_s27, 6  ;;  %s132_s3 = scalar_lea.vmem (%p48_p4), [#allocation6], %s806_s26 }
  0x1e   : > { %s1505_s27 = smov (!%p136_p13, %s135_s27), 6 }
  0x1f   : > { %s1116_s28 = sshll.u32 %s1505_s27, 8 }
  0x20   : > { %s141_s29 = ssub.s32 1536, %s1116_s28 }
  0x21   : > { %142 = vsyncadd %s1119_s30, %s141_s29  ;;  %p792_p0 = scmp.ne.s32.totalorder %s1116_s28, 0  ;;  %s805_s4 = smul.u32 1536, %s1025_s13 }
  0x22   : > { %s149_s5 = sshll.u32 %s132_s3, 4  ;;  %s923_s19 = scalar_lea.hbm %s1488_s0, 1792  ;;  %s1129_s5 = int_to_ptr.vmem [resolvable:$true] %s149_s5 }
  0x23   : > { %s1127_s8 = scalar_lea.hbm %s1488_s0, %s805_s4 }
  0x24   : > { %s919_s15 = scalar_lea.hbm %s1127_s8, %s1116_s28  ;;  %p924_p4 = scmp.lt.u32.totalorder %s1127_s8, %s1488_s0 }
  0x25   : > { %p920_p1 = scmp.ne.s32.totalorder %s1127_s8, %s919_s15  ;;  %p925_p5 = scmp.lt.u32.totalorder %s923_s19, %s919_s15 }
  0x26   : > { %p927_p7 = scmp.lt.u32.totalorder %s919_s15, %s1127_s8 }
  0x27   : > { %p921_p2 = pnand %p920_p1, %p792_p0  ;;  %p926_p6 = por %p925_p5, %p924_p4 }
  0x29   : > { %p922_p3 = pneg %p921_p2  ;;  %p928_p10 = por %p927_p7, %p926_p6 }
  0x2b   : > { %p929_p13 = pnand %p928_p10, %p922_p3 }
  0x2d   : > { %932 = shalt.err (!%p929_p13)
}
  0x2e   : > { %s933_s26 = scalar_lea.vmem %s1129_s5, %s1116_s28  ;;  %s1031_s27 = smov [#allocation6]  }
  0x2f   : > { %p934_p1 = scmp.ne.s32.totalorder %s1129_s5, %s933_s26  ;;  %s937_s29 = sshll.u32 %s1031_s27, 4  ;;  %s938_s29 = int_to_ptr.vmem [resolvable:$false] %s937_s29 }
  0x30   : > { %s939_s3 = scalar_lea.vmem %s938_s29, 3072  ;;  %p940_p11 = scmp.lt.s32.totalorder %s1129_s5, %s938_s29 }
  0x31   : > { %p935_p2 = pnand %p934_p1, %p792_p0  ;;  %p941_p4 = scmp.lt.s32.totalorder %s939_s3, %s933_s26 }
  0x33   : > { %p936_p12 = pneg %p935_p2  ;;  %p942_p5 = por %p941_p4, %p940_p11 }
  0x35   : > { %p943_p6 = pnand %p942_p5, %p936_p12 }
  0x37   : > { %946 = shalt.err (!%p943_p6)
}
  0x38   : > { %s1032_s4 = smov 256   ;;  %s1033_s6 = smov 16  }
  0x39   : > { %155 = dma.hbm_to_vmem [thread:$0]  (%p792_p0), %s1127_s8, %s1116_s28, %s1129_s5, %s1119_s30, %s1032_s4, %s1032_s4, %s1033_s6  }
  0x3a PF: > { %p797_p3 = scmp.ge.s32.totalorder %s1029_s14, 1  ;;  %p174_p7 = scmp.lt.s32.totalorder %s1029_s14, 3 }
  0x3c   : > { %p175_p10 = pnand %p797_p3, %p174_p7 }
  0x3d   : > { %s1159_s7 = sand.u32 (!%p175_p10), 1, %s1013_s10  }
  0x3e   : > { %178 = sbr.rel (%p175_p10) target bundleno = 723 (0x2d3), region = 28  ;;  %s181_s16 = scalar_lea.sflag (!%p175_p10), [#allocation7], %s1159_s7 }
  0x3f   : > { %s807_s15 = smul.u32 (!%p175_p10), 96, %s1159_s7 }
  0x41   : > { %s184_s18 = scalar_lea.vmem (!%p175_p10), [#allocation6], %s807_s15 }
  0x45   : > { %1000 = dma.done.wait (%p1096_p8), %s181_s16, 1536  }
  0x46   : > { %1002 = vsyncadd (%p1096_p8), %s181_s16, 4294965760  ;;  %vm263_vm0 = vcmask 7168   ;;  %v1034_v0 = vmov -inf   ;;  %v1173_v1 = vld [vmem:[%s184_s18] sm:$0xff]  ;;  %v1175_v2 = vld [vmem:[%s184_s18 + $0x8] sm:$0xff]  ;;  %v1035_v19 = vmov 0   ;;  %v253_v58 = vlaneseq }
  0x47   : > { %264 = vst.msk [vmem:[#allocation2] sm:$0xff] %vm263_vm0, %v1034_v0  ;;  %265 = vst.msk [vmem:[#allocation2 + $0x8] sm:$0xff] %vm263_vm0, %v1034_v0  ;;  %v1177_v3 = vld [vmem:[%s184_s18 + $0x10] sm:$0xff]  ;;  %v294_v4 = vmax.f32 %v1173_v1, %v1175_v2  ;;  %v1181_v5 = vld [vmem:[%s184_s18 + $0x18] sm:$0xff]  ;;  %869 = vset.pattern.permute.xlu0 %v1035_v19  ;;  %870 = vset.pattern.permute.xlu1 %v1035_v19  ;;  %v1036_v20 = vmov 0.0   ;;  %s220_s20 = smul.u32 6, %s1021_s12 }
  0x48   : > { %266 = vst.msk [vmem:[#allocation2 + $0x10] sm:$0xff] %vm263_vm0, %v1034_v0  ;;  %267 = vst.msk [vmem:[#allocation2 + $0x18] sm:$0xff] %vm263_vm0, %v1034_v0  ;;  %v1183_v6 = vld [vmem:[%s184_s18 + $0x20] sm:$0xff]  ;;  %v1185_v7 = vld [vmem:[%s184_s18 + $0x28] sm:$0xff]  ;;  %v297_v11 = vmax.f32 %v1177_v3, %v1181_v5  ;;  %s634_s19 = smul.u32 48, %s1021_s12  ;;  %s212_s24 = scalar_lea.vmem [#allocation9], %s1159_s7 }
  0x49   : > { %268 = vst.msk [vmem:[#allocation2 + $0x20] sm:$0xff] %vm263_vm0, %v1034_v0  ;;  %269 = vst.msk [vmem:[#allocation2 + $0x28] sm:$0xff] %vm263_vm0, %v1034_v0  ;;  %v300_v8 = vmax.f32 %v1183_v6, %v1185_v7  ;;  %v1189_v9 = vld [vmem:[%s184_s18 + $0x30] sm:$0xff]  ;;  %v1191_v10 = vld [vmem:[%s184_s18 + $0x38] sm:$0xff]  ;;  %295 = vmax.xlane.f32.xlu0 %v294_v4  ;;  %p225_p8 = scmp.lt.s32.totalorder %s220_s20, 6  ;;  %s697_s25 = sshll.u32 %s212_s24, 4  ;;  %s1436_s25 = int_to_ptr.vmem [resolvable:$true] %s697_s25 }
  0x4a   : > { %v303_v12 = vmax.f32 %v1189_v9, %v1191_v10  ;;  %v1197_v13 = vld [vmem:[%s184_s18 + $0x40] sm:$0xff]  ;;  %v1199_v14 = vld [vmem:[%s184_s18 + $0x48] sm:$0xff]  ;;  %v1201_v15 = vld [vmem:[%s184_s18 + $0x50] sm:$0xff]  ;;  %282 = vst.msk [vmem:[#allocation5] sm:$0xff] %vm263_vm0, %v1036_v20  ;;  %s799_s26 = sshll.u32 %s1021_s12, 4  ;;  %s685_s4 = scalar_lea.sflag [#allocation8], %s1159_s7 }
  0x4b   : > { %301 = vmax.xlane.f32.xlu1 %v300_v8  ;;  %v1203_v16 = vld [vmem:[%s184_s18 + $0x58] sm:$0xff]  ;;  %v306_v17 = vmax.f32 %v1197_v13, %v1199_v14  ;;  %270 = vst.msk [vmem:[#allocation3] sm:$0xff] %vm263_vm0, %v1036_v20  ;;  %271 = vst.msk [vmem:[#allocation3 + $0x8] sm:$0xff] %vm263_vm0, %v1036_v20  ;;  %s1507_s20 = smov (!%p225_p8, %s220_s20), 6  ;;  %v1306_v8 = vand.u32 127, %v253_v58  ;;  %s1441_s3 = scalar_lea.hbm %s1490_s2, %s799_s26 }
  0x4c   : > { %v309_v18 = vmax.f32 %v1201_v15, %v1203_v16  ;;  %272 = vst.msk [vmem:[#allocation3 + $0x10] sm:$0xff] %vm263_vm0, %v1036_v20  ;;  %273 = vst.msk [vmem:[#allocation3 + $0x18] sm:$0xff] %vm263_vm0, %v1036_v20  ;;  %s798_s28 = sshll.u32 %s1507_s20, 3  ;;  %s947_s6 = scalar_lea.vmem %s1436_s25, 16 }
  0x4d   : > { %298 = vmax.xlane.f32.xlu0 %v297_v11  ;;  %274 = vst.msk [vmem:[#allocation3 + $0x20] sm:$0xff] %vm263_vm0, %v1036_v20  ;;  %275 = vst.msk [vmem:[#allocation3 + $0x28] sm:$0xff] %vm263_vm0, %v1036_v20  ;;  %s1238_s8 = scalar_lea.vmem %s1489_s1, %s798_s28  ;;  %p948_p11 = scmp.ne.s32.totalorder %s1436_s25, %s947_s6 }
  0x4e   : > { %276 = vst.msk [vmem:[#allocation4] sm:$0xff] %vm263_vm0, %v1036_v20  ;;  %277 = vst.msk [vmem:[#allocation4 + $0x8] sm:$0xff] %vm263_vm0, %v1036_v20  ;;  %v1228_v21 = vld [vmem:[#allocation2] sm:$0xff]  ;;  %v1240_v26 = vld [vmem:[#allocation2 + $0x8] sm:$0xff]  ;;  %s1037_s15 = smov [#allocation9]  }
  0x4f   : > { %304 = vmax.xlane.f32.xlu1 %v303_v12  ;;  %278 = vst.msk [vmem:[#allocation4 + $0x10] sm:$0xff] %vm263_vm0, %v1036_v20  ;;  %279 = vst.msk [vmem:[#allocation4 + $0x18] sm:$0xff] %vm263_vm0, %v1036_v20  ;;  %v1230_v22 = vld [vmem:[#allocation2 + $0x10] sm:$0xff]  ;;  %v1250_v29 = vld [vmem:[#allocation2 + $0x18] sm:$0xff]  ;;  %p949_p12 = pnand %p948_p11, %p1100_p9  ;;  %s951_s12 = sshll.u32 %s1037_s15, 4  ;;  %s952_s12 = int_to_ptr.vmem [resolvable:$false] %s951_s12 }
  0x50   : > { %280 = vst.msk [vmem:[#allocation4 + $0x20] sm:$0xff] %vm263_vm0, %v1036_v20  ;;  %281 = vst.msk [vmem:[#allocation4 + $0x28] sm:$0xff] %vm263_vm0, %v1036_v20  ;;  %v249_v32 = vld [vmem:[%s1238_s8 + $0x18] sm:$0xff]  ;;  %v1263_v36 = vld [vmem:[#allocation2 + $0x20] sm:$0xff]  ;;  %s953_s16 = scalar_lea.vmem %s952_s12, 32  ;;  %p954_p13 = scmp.lt.s32.totalorder %s1436_s25, %s952_s12 }
  0x51   : > { %307 = vmax.xlane.f32.xlu0 %v306_v17  ;;  %283 = vst.msk [vmem:[#allocation5 + $0x8] sm:$0xff] %vm263_vm0, %v1036_v20  ;;  %284 = vst.msk [vmem:[#allocation5 + $0x10] sm:$0xff] %vm263_vm0, %v1036_v20  ;;  %v1270_v38 = vld [vmem:[#allocation2 + $0x28] sm:$0xff]  ;;  %v246_v47 = vld [vmem:[%s1238_s8] sm:$0xff]  ;;  %p950_p0 = pneg %p949_p12  ;;  %p955_p1 = scmp.lt.s32.totalorder %s953_s16, %s947_s6 }
  0x52   : > { %285 = vst.msk [vmem:[#allocation5 + $0x18] sm:$0xff] %vm263_vm0, %v1036_v20  ;;  %286 = vst.msk [vmem:[#allocation5 + $0x20] sm:$0xff] %vm263_vm0, %v1036_v20  ;;  %v251_v41 = vld [vmem:[%s1238_s8 + $0x28] sm:$0xff]  ;;  %v248_v49 = vld [vmem:[%s1238_s8 + $0x10] sm:$0xff] }
  0x53   : > { %310 = vmax.xlane.f32.xlu1 %v309_v18  ;;  %287 = vst.msk [vmem:[#allocation5 + $0x28] sm:$0xff] %vm263_vm0, %v1036_v20  ;;  %v247_v48 = vld [vmem:[%s1238_s8 + $0x8] sm:$0xff]  ;;  %v250_v50 = vld [vmem:[%s1238_s8 + $0x20] sm:$0xff]  ;;  %p956_p2 = por %p955_p1, %p954_p13 }
  0x55   : > { %p957_p4 = pnand %p956_p2, %p950_p0 }
  0xd6   : > { %v296_v23 = vpop.xlane.xlu0 %295 }
  0xd7   : > { %v1233_v24 = vmax.f32 %v1228_v21, %v296_v23 }
  0xd8   : > { %v302_v25 = vpop.xlane.xlu1 %301 }
  0xd9   : > { %v1243_v27 = vmax.f32 %v1230_v22, %v302_v25  ;;  %v384_v28 = vsub.f32 %v1228_v21, %v1233_v24  ;;  %559 = vst.msk [vmem:[#allocation2] sm:$0xff] %vm263_vm0, %v1233_v24  ;;  %320 = vperm.xlu0 %869, %v1233_v24   ;;  %v1312_v25 = vadd.s32 128, %v1306_v8  ;;  %v512_v24 = vld [vmem:[#allocation5 + $0x8] sm:$0xff] }
  0xda   : > { %v299_v30 = vpop.xlane.xlu0 %298 }
  0xdb   : > { %v386_v31 = vsub.f32 %v1230_v22, %v1243_v27  ;;  %561 = vst.msk [vmem:[#allocation2 + $0x10] sm:$0xff] %vm263_vm0, %v1243_v27  ;;  %v1258_v33 = vmax.f32 %v1240_v26, %v299_v30 }
  0xdc   : > { %v305_v34 = vpop.xlane.xlu1 %304 }
  0xdd   : > { %v1261_v35 = vmax.f32 %v1250_v29, %v305_v34  ;;  %v385_v37 = vsub.f32 %v1240_v26, %v1258_v33  ;;  %560 = vst.msk [vmem:[#allocation2 + $0x8] sm:$0xff] %vm263_vm0, %v1258_v33  ;;  %325 = vperm.xlu1 %870, %v1258_v33   ;;  %491 = vperm.xlu0 %869, %v249_v32   ;;  %v403_v33 = vld [vmem:[#allocation3 + $0x8] sm:$0xff] }
  0xde   : > { %v308_v40 = vpop.xlane.xlu0 %307 }
  0xdf   : > { %v387_v39 = vsub.f32 %v1250_v29, %v1261_v35  ;;  %562 = vst.msk [vmem:[#allocation2 + $0x18] sm:$0xff] %vm263_vm0, %v1261_v35  ;;  %v1278_v42 = vmax.f32 %v1263_v36, %v308_v40 }
  0xe0   : > { %v311_v43 = vpop.xlane.xlu1 %310 }
  0xe1   : > { %v1281_v44 = vmax.f32 %v1270_v38, %v311_v43  ;;  %330 = vperm.xlu1 %870, %v1243_v27   ;;  %v388_v45 = vsub.f32 %v1263_v36, %v1278_v42  ;;  %563 = vst.msk [vmem:[#allocation2 + $0x20] sm:$0xff] %vm263_vm0, %v1278_v42  ;;  %497 = vperm.xlu0 %869, %v251_v41   ;;  %v445_v27 = vld [vmem:[#allocation4] sm:$0xff] }
  0xe3   : > { %v389_v46 = vsub.f32 %v1270_v38, %v1281_v44  ;;  %564 = vst.msk [vmem:[#allocation2 + $0x28] sm:$0xff] %vm263_vm0, %v1281_v44 }
  0xe5   : > { %335 = vperm.xlu1 %870, %v1261_v35   ;;  %v400_v22 = vmul.f32 1.442695, %v389_v46  ;;  %v402_v46 = vld [vmem:[#allocation3] sm:$0xff] }
  0xe9   : > { %340 = vperm.xlu1 %870, %v1278_v42  }
  0xed   : > { %345 = vperm.xlu1 %870, %v1281_v44  }
  0xf1   : > { %482 = vperm.xlu1 %870, %v246_v47  }
  0xf5   : > { %485 = vperm.xlu1 %870, %v247_v48  }
  0xf9   : > { %488 = vperm.xlu1 %870, %v248_v49  }
  0xfd   : > { %494 = vperm.xlu1 %870, %v250_v50  }
 0x158   : > { %v321_v52 = vpop.permute.xlu0 %320 }
 0x159   : > { %v348_v54 = vsub.f32 %v1173_v1, %v321_v52  ;;  %v349_v55 = vsub.f32 %v1175_v2, %v321_v52 }
 0x15b   : > { %v360_v60 = vmul.f32 1.442695, %v348_v54  ;;  %v362_v62 = vmul.f32 1.442695, %v349_v55 }
 0x15c   : > { %v326_v51 = vpop.permute.xlu1 %325 }
 0x15d   : > { %v350_v57 = vsub.f32 %v1177_v3, %v326_v51  ;;  %v351_v59 = vsub.f32 %v1181_v5, %v326_v51  ;;  %871 = vpow2.f32 %v360_v60 }
 0x15e   : > { %873 = vpow2.f32 %v362_v62 }
 0x15f   : > { %v364_v4 = vmul.f32 1.442695, %v350_v57  ;;  %v366_v11 = vmul.f32 1.442695, %v351_v59 }
 0x160   : > { %v331_v53 = vpop.permute.xlu1 %330 }
 0x161   : > { %v352_v61 = vsub.f32 %v1183_v6, %v331_v53  ;;  %v353_v63 = vsub.f32 %v1185_v7, %v331_v53  ;;  %875 = vpow2.f32 %v364_v4  ;;  %v451_v53 = vadd.f32 %v1175_v2, %v1173_v1 }
 0x162   : > { %877 = vpow2.f32 %v366_v11 }
 0x163   : > { %v368_v12 = vmul.f32 1.442695, %v352_v61  ;;  %v370_v18 = vmul.f32 1.442695, %v353_v63 }
 0x164   : > { %v336_v56 = vpop.permute.xlu1 %335 }
 0x165   : > { %v354_v17 = vsub.f32 %v1189_v9, %v336_v56  ;;  %v355_v19 = vsub.f32 %v1191_v10, %v336_v56  ;;  %879 = vpow2.f32 %v368_v12 }
 0x166   : > { %881 = vpow2.f32 %v370_v18 }
 0x167   : > { %v372_v32 = vmul.f32 1.442695, %v354_v17  ;;  %v374_v34 = vmul.f32 1.442695, %v355_v19  ;;  %v872_v54 = vpop.eup %871 }
 0x168   : > { %v341_v0 = vpop.permute.xlu1 %340  ;;  %v874_v56 = vpop.eup %873 }
 0x169   : > { %v356_v23 = vsub.f32 %v1197_v13, %v341_v0  ;;  %v357_v30 = vsub.f32 %v1199_v14, %v341_v0  ;;  %883 = vpow2.f32 %v372_v32 }
 0x16a   : > { %885 = vpow2.f32 %v374_v34  ;;  %v492_v34 = vpop.permute.xlu0 %491 }
 0x16b   : > { %v376_v41 = vmul.f32 1.442695, %v356_v23  ;;  %v378_v47 = vmul.f32 1.442695, %v357_v30  ;;  %v876_v61 = vpop.eup %875  ;;  %vm505_vm7 = vcmp.eq.s32.totalorder %v1306_v8, %v492_v34  ;;  %vm506_vm8 = vcmp.eq.s32.totalorder %v1312_v25, %v492_v34 }
 0x16c   : > { %v346_v20 = vpop.permute.xlu1 %345  ;;  %v878_v63 = vpop.eup %877 }
 0x16d   : > { %v358_v43 = vsub.f32 %v1201_v15, %v346_v20  ;;  %v359_v48 = vsub.f32 %v1203_v16, %v346_v20  ;;  %887 = vpow2.f32 %v376_v41  ;;  %v417_v4 = vadd.f32 %v878_v63, %v876_v61 }
 0x16e   : > { %889 = vpow2.f32 %v378_v47  ;;  %v414_v20 = vadd.f32 %v874_v56, %v872_v54  ;;  %v460_v56 = vadd.f32 %v1191_v10, %v1189_v9 }
 0x16f   : > { %v380_v55 = vmul.f32 1.442695, %v358_v43  ;;  %v382_v57 = vmul.f32 1.442695, %v359_v48  ;;  %v880_v0 = vpop.eup %879 }
 0x170   : > { %v483_v40 = vpop.permute.xlu1 %482 }
 0x171   : > { %vm499_vm1 = vcmp.eq.s32.totalorder %v1306_v8, %v483_v40  ;;  %vm500_vm2 = vcmp.eq.s32.totalorder %v1312_v25, %v483_v40  ;;  %891 = vpow2.f32 %v380_v55 }
 0x172   : > { %v517_v49 = vsel %vm499_vm1, %v1173_v1, 0.0  ;;  %v518_v50 = vsel %vm500_vm2, %v1175_v2, 0.0  ;;  %v454_v1 = vadd.f32 %v1181_v5, %v1177_v3  ;;  %v882_v2 = vpop.eup %881  ;;  %893 = vpow2.f32 %v382_v57 }
 0x173   : > { %v529_v51 = vadd.f32 %v518_v50, %v517_v49  ;;  %v884_v11 = vpop.eup %883  ;;  %v420_v19 = vadd.f32 %v882_v2, %v880_v0  ;;  %v523_v49 = vsel %vm505_vm7, %v1189_v9, 0.0  ;;  %v524_v50 = vsel %vm506_vm8, %v1191_v10, 0.0 }
 0x174   : > { %v486_v52 = vpop.permute.xlu1 %485  ;;  %v886_v12 = vpop.eup %885  ;;  %v392_v9 = vmul.f32 1.442695, %v385_v37  ;;  %v390_v10 = vmul.f32 1.442695, %v384_v28  ;;  %v446_v37 = vld [vmem:[#allocation4 + $0x8] sm:$0xff] }
 0x175   : > { %vm501_vm3 = vcmp.eq.s32.totalorder %v1306_v8, %v486_v52  ;;  %vm502_vm4 = vcmp.eq.s32.totalorder %v1312_v25, %v486_v52  ;;  %530 = vadd.xlane.f32.xlu0 %v529_v51  ;;  %v457_v51 = vadd.f32 %v1185_v7, %v1183_v6  ;;  %v498_v52 = vpop.permute.xlu0 %497 }
 0x176   : > { %v519_v59 = vsel %vm501_vm3, %v1177_v3, 0.0  ;;  %v520_v60 = vsel %vm502_vm4, %v1181_v5, 0.0  ;;  %v423_v5 = vadd.f32 %v886_v12, %v884_v11  ;;  %vm509_vm11 = vcmp.eq.s32.totalorder %v1306_v8, %v498_v52  ;;  %v405_v12 = vld [vmem:[#allocation3 + $0x18] sm:$0xff] }
 0x177   : > { %v532_v62 = vadd.f32 %v520_v60, %v519_v59  ;;  %v888_v18 = vpop.eup %887  ;;  %vm510_vm12 = vcmp.eq.s32.totalorder %v1312_v25, %v498_v52  ;;  %v527_v59 = vsel %vm509_vm11, %v1201_v15, 0.0  ;;  %895 = vpow2.f32 %v392_v9  ;;  %v447_v52 = vld [vmem:[#allocation4 + $0x10] sm:$0xff] }
 0x178   : > { %v489_v17 = vpop.permute.xlu1 %488  ;;  %v890_v23 = vpop.eup %889  ;;  %897 = vpow2.f32 %v390_v10 }
 0x179   : > { %452 = vadd.xlane.f32.xlu0 %v451_v53  ;;  %533 = vadd.xlane.f32.xlu1 %v532_v62  ;;  %vm503_vm5 = vcmp.eq.s32.totalorder %v1306_v8, %v489_v17  ;;  %vm504_vm6 = vcmp.eq.s32.totalorder %v1312_v25, %v489_v17  ;;  %v426_v3 = vadd.f32 %v890_v23, %v888_v18  ;;  %v406_v17 = vld [vmem:[#allocation3 + $0x20] sm:$0xff] }
 0x17a   : > { %v521_v40 = vsel %vm503_vm5, %v1183_v6, 0.0  ;;  %v522_v41 = vsel %vm504_vm6, %v1185_v7, 0.0  ;;  %v538_v53 = vadd.f32 %v524_v50, %v523_v49  ;;  %v528_v6 = vsel %vm510_vm12, %v1203_v16, 0.0 }
 0x17b   : > { %v892_v30 = vpop.eup %891  ;;  %v535_v47 = vadd.f32 %v522_v41, %v521_v40  ;;  %v463_v7 = vadd.f32 %v1199_v14, %v1197_v13  ;;  %v544_v60 = vadd.f32 %v528_v6, %v527_v59  ;;  %v513_v41 = vld [vmem:[#allocation5 + $0x10] sm:$0xff] }
 0x17c   : > { %v894_v32 = vpop.eup %893  ;;  %v495_v43 = vpop.permute.xlu1 %494 }
 0x17d   : > { %418 = vadd.xlane.f32.xlu0 %v417_v4  ;;  %455 = vadd.xlane.f32.xlu1 %v454_v1  ;;  %v429_v48 = vadd.f32 %v894_v32, %v892_v30  ;;  %vm507_vm9 = vcmp.eq.s32.totalorder %v1306_v8, %v495_v43  ;;  %vm508_vm10 = vcmp.eq.s32.totalorder %v1312_v25, %v495_v43  ;;  %v404_v25 = vld [vmem:[#allocation3 + $0x10] sm:$0xff]  ;;  %v407_v32 = vld [vmem:[#allocation3 + $0x28] sm:$0xff] }
 0x17e   : > { %v525_v54 = vsel %vm507_vm9, %v1197_v13, 0.0  ;;  %v526_v55 = vsel %vm508_vm10, %v1199_v14, 0.0  ;;  %v466_v8 = vadd.f32 %v1203_v16, %v1201_v15  ;;  %v394_v13 = vmul.f32 1.442695, %v386_v31  ;;  %v511_v16 = vld [vmem:[#allocation5] sm:$0xff] }
 0x17f   : > { %v541_v57 = vadd.f32 %v526_v55, %v525_v54  ;;  %v396_v14 = vmul.f32 1.442695, %v387_v39  ;;  %v398_v15 = vmul.f32 1.442695, %v388_v45  ;;  %v514_v54 = vld [vmem:[#allocation5 + $0x18] sm:$0xff] }
 0x180   : > { %899 = vpow2.f32 %v394_v13 }
 0x181   : > { %421 = vadd.xlane.f32.xlu0 %v420_v19  ;;  %415 = vadd.xlane.f32.xlu1 %v414_v20  ;;  %901 = vpow2.f32 %v396_v14  ;;  %v896_v28 = vpop.eup %895  ;;  %v1390_v14 = vstv %s634_s19 }
 0x182   : > { %903 = vpow2.f32 %v398_v15  ;;  %v898_v39 = vpop.eup %897  ;;  %v409_v42 = vmul.f32 %v896_v28, %v403_v33  ;;  %v449_v28 = vld [vmem:[#allocation4 + $0x20] sm:$0xff] }
 0x183   : > { %905 = vpow2.f32 %v400_v22  ;;  %v408_v0 = vmul.f32 %v898_v39, %v402_v46 }
 0x185   : > { %427 = vadd.xlane.f32.xlu0 %v426_v3  ;;  %424 = vadd.xlane.f32.xlu1 %v423_v5 }
 0x189   : > { %536 = vadd.xlane.f32.xlu0 %v535_v47  ;;  %430 = vadd.xlane.f32.xlu1 %v429_v48 }
 0x18a   : > { %v900_v38 = vpop.eup %899 }
 0x18b   : > { %v902_v63 = vpop.eup %901  ;;  %v410_v1 = vmul.f32 %v900_v38, %v404_v25 }
 0x18c   : > { %v904_v2 = vpop.eup %903  ;;  %v411_v20 = vmul.f32 %v902_v63, %v405_v12 }
 0x18d   : > { %458 = vadd.xlane.f32.xlu1 %v457_v51  ;;  %539 = vadd.xlane.f32.xlu0 %v538_v53  ;;  %v412_v23 = vmul.f32 %v904_v2, %v406_v17  ;;  %v906_v30 = vpop.eup %905  ;;  %v1381_v53 = vshrl.u32 %v253_v58, 7 }
 0x18e   : > { %v413_v47 = vmul.f32 %v906_v30, %v407_v32 }
 0x18f   : > { %v637_v58 = vadd.s32 8, %v1381_v53  ;;  %v638_v13 = vadd.s32 16, %v1381_v53  ;;  %v640_v39 = vadd.s32 32, %v1381_v53 }
 0x191   : > { %461 = vadd.xlane.f32.xlu1 %v460_v56  ;;  %542 = vadd.xlane.f32.xlu0 %v541_v57  ;;  %v647_v30 = vadd.s32 %v1390_v14, %v640_v39 }
 0x193   : > { %vm653_vm2 = vcmp.lt.s32.totalorder %v647_v30, 50 }
 0x195   : > { %464 = vadd.xlane.f32.xlu1 %v463_v7  ;;  %545 = vadd.xlane.f32.xlu0 %v544_v60  ;;  %v448_v60 = vld [vmem:[#allocation4 + $0x18] sm:$0xff] }
 0x199   : > { %467 = vadd.xlane.f32.xlu1 %v466_v8  ;;  %v515_v8 = vld [vmem:[#allocation5 + $0x20] sm:$0xff] }
 0x202   : > { %v531_v26 = vpop.xlane.xlu0 %530 }
 0x203   : > { %v547_v21 = vadd.f32 %v531_v26, %v511_v16  ;;  %v639_v26 = vadd.s32 24, %v1381_v53 }
 0x205   : > { %553 = vst.msk [vmem:[#allocation5] sm:$0xff] %vm263_vm0, %v547_v21 }
 0x206   : > { %v534_v29 = vpop.xlane.xlu1 %533  ;;  %v453_v31 = vpop.xlane.xlu0 %452 }
 0x207   : > { %v548_v35 = vadd.f32 %v534_v29, %v512_v24  ;;  %v469_v36 = vadd.f32 %v453_v31, %v445_v27  ;;  %v516_v29 = vld [vmem:[#allocation5 + $0x28] sm:$0xff] }
 0x209   : > { %554 = vst.msk [vmem:[#allocation5 + $0x8] sm:$0xff] %vm263_vm0, %v548_v35  ;;  %475 = vst.msk [vmem:[#allocation4] sm:$0xff] %vm263_vm0, %v469_v36  ;;  %v1395_v35 = vadd.s32 %v1390_v14, %v1381_v53  ;;  %v1398_v36 = vadd.s32 %v1390_v14, %v637_v58 }
 0x20a   : > { %v456_v44 = vpop.xlane.xlu1 %455  ;;  %v419_v45 = vpop.xlane.xlu0 %418 }
 0x20b   : > { %v470_v61 = vadd.f32 %v456_v44, %v446_v37  ;;  %v433_v62 = vadd.f32 %v419_v45, %v409_v42  ;;  %v587_v37 = vld [vmem:[#allocation2 + $0x8] sm:$0xff]  ;;  %v1404_v42 = vadd.s32 %v1390_v14, %v638_v13  ;;  %vm649_vm13 = vcmp.lt.s32.totalorder %v1395_v35, 50 }
 0x20c   : > { %v598_v2 = vld [vmem:[#allocation5] sm:$0xff]  ;;  %vm650_vm14 = vcmp.lt.s32.totalorder %v1398_v36, 50 }
 0x20d   : > { %476 = vst.msk [vmem:[#allocation4 + $0x8] sm:$0xff] %vm263_vm0, %v470_v61  ;;  %440 = vst.msk [vmem:[#allocation3 + $0x8] sm:$0xff] %vm263_vm0, %v433_v62  ;;  %v1407_v61 = vadd.s32 %v1390_v14, %v639_v26  ;;  %vm651_vm15 = vcmp.lt.s32.totalorder %v1404_v42, 50 }
 0x20e   : > { %v416_v4 = vpop.xlane.xlu1 %415  ;;  %v422_v11 = vpop.xlane.xlu0 %421 }
 0x20f   : > { %v432_v18 = vadd.f32 %v416_v4, %v408_v0  ;;  %v434_v19 = vadd.f32 %v422_v11, %v410_v1  ;;  %v586_v1 = vld [vmem:[#allocation2] sm:$0xff]  ;;  %v450_v11 = vld [vmem:[#allocation4 + $0x28] sm:$0xff]  ;;  %vm652_vm1 = vcmp.lt.s32.totalorder %v1407_v61, 50 }
 0x210   : > { %v599_v27 = vld [vmem:[#allocation5 + $0x8] sm:$0xff] }
 0x211   : > { %439 = vst.msk [vmem:[#allocation3] sm:$0xff] %vm263_vm0, %v432_v18  ;;  %441 = vst.msk [vmem:[#allocation3 + $0x10] sm:$0xff] %vm263_vm0, %v434_v19  ;;  %v605_v46 = vmul.f32 0.9, %v599_v27 }
 0x212   : > { %v425_v3 = vpop.xlane.xlu1 %424  ;;  %v428_v5 = vpop.xlane.xlu0 %427 }
 0x213   : > { %v435_v34 = vadd.f32 %v425_v3, %v411_v20  ;;  %v436_v40 = vadd.f32 %v428_v5, %v412_v23  ;;  %v616_v20 = vld [vmem:[#allocation4] sm:$0xff]  ;;  %v588_v5 = vld [vmem:[#allocation2 + $0x10] sm:$0xff] }
 0x214   : > { %v569_v43 = vld [vmem:[#allocation3 + $0x8] sm:$0xff]  ;;  %v617_v25 = vld [vmem:[#allocation4 + $0x8] sm:$0xff] }
 0x215   : > { %442 = vst.msk [vmem:[#allocation3 + $0x18] sm:$0xff] %vm263_vm0, %v435_v34  ;;  %443 = vst.msk [vmem:[#allocation3 + $0x20] sm:$0xff] %vm263_vm0, %v436_v40  ;;  %907 = vlog2.f32 %v569_v43  ;;  %v623_v23 = vmul.f32 0.000390625, %v617_v25  ;;  %v604_v34 = vmul.f32 0.9, %v598_v2 }
 0x216   : > { %v431_v48 = vpop.xlane.xlu1 %430  ;;  %v537_v49 = vpop.xlane.xlu0 %536 }
 0x217   : > { %v437_v50 = vadd.f32 %v431_v48, %v413_v47  ;;  %v549_v51 = vadd.f32 %v537_v49, %v513_v41  ;;  %v641_v41 = vadd.s32 40, %v1381_v53  ;;  %v589_v48 = vld [vmem:[#allocation2 + $0x18] sm:$0xff] }
 0x218   : > { %v568_v55 = vld [vmem:[#allocation3] sm:$0xff]  ;;  %v570_v56 = vld [vmem:[#allocation3 + $0x10] sm:$0xff] }
 0x219   : > { %444 = vst.msk [vmem:[#allocation3 + $0x28] sm:$0xff] %vm263_vm0, %v437_v50  ;;  %555 = vst.msk [vmem:[#allocation5 + $0x10] sm:$0xff] %vm263_vm0, %v549_v51  ;;  %909 = vlog2.f32 %v568_v55 }
 0x21a   : > { %v459_v57 = vpop.xlane.xlu1 %458  ;;  %v540_v59 = vpop.xlane.xlu0 %539  ;;  %911 = vlog2.f32 %v570_v56 }
 0x21b   : > { %v471_v6 = vadd.f32 %v459_v57, %v447_v52  ;;  %v550_v7 = vadd.f32 %v540_v59, %v514_v54 }
 0x21c   : > { %v571_v9 = vld [vmem:[#allocation3 + $0x18] sm:$0xff]  ;;  %v572_v10 = vld [vmem:[#allocation3 + $0x20] sm:$0xff] }
 0x21d   : > { %477 = vst.msk [vmem:[#allocation4 + $0x10] sm:$0xff] %vm263_vm0, %v471_v6  ;;  %556 = vst.msk [vmem:[#allocation5 + $0x18] sm:$0xff] %vm263_vm0, %v550_v7  ;;  %913 = vlog2.f32 %v571_v9  ;;  %v622_v6 = vmul.f32 0.000390625, %v616_v20  ;;  %v590_v9 = vld [vmem:[#allocation2 + $0x20] sm:$0xff] }
 0x21e   : > { %v462_v15 = vpop.xlane.xlu1 %461  ;;  %v543_v16 = vpop.xlane.xlu0 %542  ;;  %915 = vlog2.f32 %v572_v10 }
 0x21f   : > { %v908_v21 = vpop.eup %907  ;;  %v472_v22 = vadd.f32 %v462_v15, %v448_v60  ;;  %v551_v24 = vadd.f32 %v543_v16, %v515_v8 }
 0x220   : > { %v573_v31 = vld [vmem:[#allocation3 + $0x28] sm:$0xff]  ;;  %v577_v33 = vmul.f32 0.6931472, %v908_v21  ;;  %v600_v17 = vld [vmem:[#allocation5 + $0x10] sm:$0xff] }
 0x221   : > { %478 = vst.msk [vmem:[#allocation4 + $0x18] sm:$0xff] %vm263_vm0, %v472_v22  ;;  %557 = vst.msk [vmem:[#allocation5 + $0x20] sm:$0xff] %vm263_vm0, %v551_v24  ;;  %917 = vlog2.f32 %v573_v31  ;;  %v606_v51 = vmul.f32 0.9, %v600_v17  ;;  %v648_v31 = vadd.s32 %v1390_v14, %v641_v41 }
 0x222   : > { %v465_v38 = vpop.xlane.xlu1 %464  ;;  %v546_v44 = vpop.xlane.xlu0 %545  ;;  %v593_v45 = vadd.f32 %v587_v37, %v577_v33  ;;  %v591_v37 = vld [vmem:[#allocation2 + $0x28] sm:$0xff] }
 0x223   : > { %v910_v62 = vpop.eup %909  ;;  %v473_v63 = vadd.f32 %v465_v38, %v449_v28  ;;  %v552_v0 = vadd.f32 %v546_v44, %v516_v29  ;;  %vm654_vm3 = vcmp.lt.s32.totalorder %v648_v31, 50 }
 0x224   : > { %v912_v4 = vpop.eup %911  ;;  %v575_v12 = vmul.f32 0.6931472, %v910_v62  ;;  %v611_v18 = vsub.f32 %v593_v45, %v605_v46  ;;  %v618_v40 = vld [vmem:[#allocation4 + $0x10] sm:$0xff]  ;;  %v601_v50 = vld [vmem:[#allocation5 + $0x18] sm:$0xff] }
 0x225   : > { %479 = vst.msk [vmem:[#allocation4 + $0x20] sm:$0xff] %vm263_vm0, %v473_v63  ;;  %558 = vst.msk [vmem:[#allocation5 + $0x28] sm:$0xff] %vm263_vm0, %v552_v0  ;;  %v579_v19 = vmul.f32 0.6931472, %v912_v4  ;;  %v624_v8 = vmul.f32 0.000390625, %v618_v40 }
 0x226   : > { %v468_v3 = vpop.xlane.xlu1 %467  ;;  %v592_v32 = vadd.f32 %v586_v1, %v575_v12  ;;  %v629_v52 = vsub.f32 %v611_v18, %v623_v23  ;;  %v607_v58 = vmul.f32 0.9, %v601_v50 }
 0x227   : > { %v914_v43 = vpop.eup %913  ;;  %v474_v47 = vadd.f32 %v468_v3, %v450_v11  ;;  %v594_v49 = vadd.f32 %v588_v5, %v579_v19 }
 0x228   : > { %v916_v54 = vpop.eup %915  ;;  %v581_v55 = vmul.f32 0.6931472, %v914_v43  ;;  %v602_v56 = vld [vmem:[#allocation5 + $0x20] sm:$0xff]  ;;  %v610_v57 = vsub.f32 %v592_v32, %v604_v34  ;;  %v619_v59 = vld [vmem:[#allocation4 + $0x18] sm:$0xff]  ;;  %v656_v22 = vsel %vm650_vm14, %v629_v52, 0.0 }
 0x229   : > { %480 = vst.msk [vmem:[#allocation4 + $0x28] sm:$0xff] %vm263_vm0, %v474_v47  ;;  %v583_v7 = vmul.f32 0.6931472, %v916_v54  ;;  %v608_v60 = vmul.f32 0.9, %v602_v56  ;;  %v612_v53 = vsub.f32 %v594_v49, %v606_v51  ;;  %v662_v62 = vsel %vm263_vm0, %v656_v22, 0.0 }
 0x22a   : > { %v595_v10 = vadd.f32 %v589_v48, %v581_v55  ;;  %v628_v13 = vsub.f32 %v610_v57, %v622_v6  ;;  %v625_v26 = vmul.f32 0.000390625, %v619_v59 }
 0x22b   : > { %v918_v15 = vpop.eup %917  ;;  %v596_v16 = vadd.f32 %v590_v9, %v583_v7  ;;  %v630_v21 = vsub.f32 %v612_v53, %v624_v8 }
 0x22c   : > { %v585_v24 = vmul.f32 0.6931472, %v918_v15  ;;  %v603_v27 = vld [vmem:[#allocation5 + $0x28] sm:$0xff]  ;;  %v613_v28 = vsub.f32 %v595_v10, %v607_v58  ;;  %v620_v29 = vld [vmem:[#allocation4 + $0x20] sm:$0xff]  ;;  %v655_v33 = vsel %vm649_vm13, %v628_v13, 0.0 }
 0x22d   : > { %v609_v39 = vmul.f32 0.9, %v603_v27  ;;  %v614_v38 = vsub.f32 %v596_v16, %v608_v60  ;;  %v626_v44 = vmul.f32 0.000390625, %v620_v29  ;;  %v657_v45 = vsel %vm651_vm15, %v630_v21, 0.0 }
 0x22e   : > { %v597_v46 = vadd.f32 %v591_v37, %v585_v24  ;;  %v631_v25 = vsub.f32 %v613_v28, %v625_v26  ;;  %v661_v36 = vsel %vm263_vm0, %v655_v33, 0.0  ;;  %v664_v2 = vsel %vm263_vm0, %v657_v45, 0.0 }
 0x22f   : > { %v632_v63 = vsub.f32 %v614_v38, %v626_v44  ;;  %v663_v0 = vadd.f32 %v662_v62, %v661_v36 }
 0x230   : > { %v615_v1 = vsub.f32 %v597_v46, %v609_v39  ;;  %v621_v14 = vld [vmem:[#allocation4 + $0x28] sm:$0xff]  ;;  %v658_v35 = vsel %vm652_vm1, %v631_v25, 0.0 }
 0x231   : > { %v627_v4 = vmul.f32 0.000390625, %v621_v14  ;;  %v659_v11 = vsel %vm653_vm2, %v632_v63, 0.0  ;;  %v665_v42 = vadd.f32 %v664_v2, %v663_v0  ;;  %v666_v12 = vsel %vm263_vm0, %v658_v35, 0.0 }
 0x232   : > { %v668_v17 = vsel %vm263_vm0, %v659_v11, 0.0 }
 0x233   : > { %v633_v18 = vsub.f32 %v615_v1, %v627_v4  ;;  %v667_v19 = vadd.f32 %v666_v12, %v665_v42 }
 0x235   : > { %v660_v20 = vsel %vm654_vm3, %v633_v18, 0.0  ;;  %v669_v23 = vadd.f32 %v668_v17, %v667_v19 }
 0x236   : > { %v670_v61 = vsel %vm263_vm0, %v660_v20, 0.0 }
 0x237   : > { %v671_v3 = vadd.f32 %v670_v61, %v669_v23 }
 0x239   : > { %v672_v5 = vrot.slane %v671_v3, 4 }
 0x23b   : > { %v673_v32 = vadd.f32 %v672_v5, %v671_v3 }
 0x23d   : > { %v674_v30 = vrot.slane %v673_v32, 2 }
 0x23f   : > { %v675_v34 = vadd.f32 %v674_v30, %v673_v32 }
 0x241   : > { %v676_v40 = vrot.slane %v675_v34, 1 }
 0x243   : > { %v677_v41 = vadd.f32 %v676_v40, %v675_v34 }
 0x245   : > { %680 = vperm.xlu0 %869, %v677_v41  }
 0x2c4   : > { %v681_v43 = vpop.permute.xlu0 %680 }
 0x2c5   : > { %683 = vst [vmem:[%s212_s24] sm:$0x1] %v681_v43 }
 0x2c6   : > { %960 = shalt.err (!%p957_p4)
}
 0x2c7   : > { %s961_s7 = scalar_lea.hbm %s1441_s3, 16  ;;  %s965_s28 = scalar_lea.hbm %s1490_s2, 32 }
 0x2c8   : > { %p962_p5 = scmp.ne.s32.totalorder %s1441_s3, %s961_s7  ;;  %p966_p7 = scmp.lt.u32.totalorder %s1441_s3, %s1490_s2 }
 0x2c9   : > { %p967_p10 = scmp.lt.u32.totalorder %s965_s28, %s961_s7  ;;  %p969_p11 = scmp.lt.u32.totalorder %s961_s7, %s1441_s3 }
 0x2ca   : > { %p963_p6 = pnand %p962_p5, %p1100_p9 }
 0x2cb   : > { %p968_p8 = por %p967_p10, %p966_p7 }
 0x2cc   : > { %p964_p3 = pneg %p963_p6 }
 0x2cd   : > { %p970_p12 = por %p969_p11, %p968_p8 }
 0x2cf   : > { %p971_p0 = pnand %p970_p12, %p964_p3 }
 0x2d1   : > { %974 = shalt.err (!%p971_p0)
}
 0x2d2   : > { %809 = dma.vmem_to_hbm [thread:$0]  (%p1100_p9), %s1436_s25, 16, %s1441_s3, %s685_s4  }
 0x2d3 PF: > { %s709_s8 = sand.u32 1, %s1009_s9   ;;  %p1495_p13 = scmp.ne.s32.totalorder %s1494_s23, 0 }
 0x2d4   : > { %p1496_p1 = scmp.ge.s32.totalorder %s1029_s14, 2  ;;  %s710_s19 = scalar_lea.sflag [#allocation8], %s709_s8 }
 0x2d6   : > { %p812_p2 = pnand %p1496_p1, %p1495_p13 }
 0x2d8   : > { %1004 = dma.done.wait (!%p812_p2), %s710_s19, 16  }
 0x2d9   : > { %1006 = vsyncadd (!%p812_p2), %s710_s19, 4294967280  ;;  %s18_s14 = sadd.s32 1, %s1029_s14   ;;  %s1497_s9 = smov %s1013_s10 }
 0x2da   : > { %p15_p4 = scmp.ge.s32.totalorder %s18_s14, 4   ;;  %s1498_s10 = smov %s1017_s11 }
 0x2db   : > { %s1499_s11 = smov %s1105_s22  ;;  %s1500_s12 = smov %s1025_s13 }
 0x2dc   : > { %s1501_s13 = smov %s1503_s17  ;;  %17 = sbr.rel (!%p15_p4) target bundleno = 6 (0x6), region = 84 }
 0x2e3   :  { %714 = vsyncpa [#allocation7], 1 }
 0x2e4   :  { %716 = vsyncpa [#allocation7 + $0x1], 1 }
 0x2e5   :  { %717 = vsyncpa [#allocation8], 1 }
 0x2e6   :  { %719 = vsyncpa [#allocation8 + $0x1], 1 }

</bundles_post_ra>
